<compile_context>
chip_gen: v7x
topology: tpu7x:2x2x1
jax: 0.10.0
libtpu: 0.0.40
codegen_flags: <defaults>
</compile_context>

<pallas_src>
from collections import namedtuple

import jax
import jax.numpy as jnp
from jax.experimental import pallas as pl
from jax.experimental.pallas import tpu as pltpu


# Generation-safe VMEM budgeting (v7x has 64 MiB physical / 32 MiB scoped default).
_VMEM_LIMIT_BYTES = 32 * 1024 * 1024      # explicit scoped-VMEM limit for the call
_VMEM_DATA_BUDGET = 20 * 1024 * 1024      # budget for streamed + resident buffers


# ---------------------------------------------------------------------------
# Fused Pallas kernel:
#   o[:, :] = sum_g  x_g @ W_blockcol[g]  + b        (one packed [TILE_N, P] store)
# ---------------------------------------------------------------------------
def _make_fused_kernel(num_groups):
    def kernel(*refs):
        x_refs = refs[:num_groups]              # each [TILE_N, H], x dtype
        w_ref = refs[num_groups]                # [G, H, P] block-column weights, x dtype
        b_ref = refs[num_groups + 1]            # [1, P] f32
        o_ref = refs[num_groups + 2]            # [TILE_N, P]
        acc = jnp.dot(x_refs[0][...], w_ref[0],
                      preferred_element_type=jnp.float32)
        for g in range(1, num_groups):          # small static loop, unrolled
            acc = acc + jnp.dot(x_refs[g][...], w_ref[g],
                                preferred_element_type=jnp.float32)
        o_ref[...] = (acc + b_ref[...]).astype(o_ref.dtype)
    return kernel


def _pick_block_n(N, row_gran, tile_n, num_groups, H, P, x_itemsize):
    """Row-tile size under the VMEM data budget; prefer >=2 tiles (v7x megacore)."""
    per_row = 2 * (num_groups * H + P) * x_itemsize          # double-buffered streams
    resident = 2 * (num_groups * H * P * x_itemsize + P * 4)  # W (x dtype) + b (f32)
    max_rows = max(row_gran, (_VMEM_DATA_BUDGET - resident) // per_row)
    blk = min(tile_n, max_rows)
    blk = max(row_gran, (blk // row_gran) * row_gran)
    if N <= blk:
        # Split into two row tiles when N allows it so both v7x TensorCores work.
        if N >= 2 * row_gran:
            half = -(-N // 2)                                  # ceil(N / 2)
            half = -(-half // row_gran) * row_gran             # roundup to granularity
            if half < N:
                return half, pl.cdiv(N, half)
        return N, 1                                            # full-dim block (always legal)
    return blk, pl.cdiv(N, blk)


def fused_readout_pallas(xs, w_all, b_all, total_pad, tile_n=4096):
    """xs: list of [N, H] (same N/H/dtype); w_all: [G, H, P] in xs dtype;
    b_all: [1, P] f32.  Returns the packed slab [N, P] in the input dtype."""
    num_groups = len(xs)
    N, H = xs[0].shape
    x_dtype = xs[0].dtype
    assert all(x.shape == (N, H) and x.dtype == x_dtype for x in xs)
    assert w_all.shape == (num_groups, H, total_pad) and w_all.dtype == x_dtype
    assert b_all.shape == (1, total_pad)

    x_itemsize = jnp.dtype(x_dtype).itemsize
    row_gran = 8 if x_itemsize >= 4 else (16 if x_itemsize == 2 else 32)
    blk_n, grid_n = _pick_block_n(N, row_gran, tile_n, num_groups, H,
                                  total_pad, x_itemsize)

    cost = pl.CostEstimate(
        flops=2 * N * num_groups * H * total_pad,
        transcendentals=0,
        bytes_accessed=(num_groups * N * H * x_itemsize
                        + w_all.size * x_itemsize
                        + b_all.size * 4
                        + N * total_pad * x_itemsize),
    )

    in_specs = [pl.BlockSpec((blk_n, H), lambda i: (i, 0))
                for _ in range(num_groups)]
    in_specs += [
        pl.BlockSpec((num_groups, H, total_pad), lambda i: (0, 0, 0)),  # resident W
        pl.BlockSpec((1, total_pad), lambda i: (0, 0)),                 # resident b
    ]

    return pl.pallas_call(
        _make_fused_kernel(num_groups),
        out_shape=jax.ShapeDtypeStruct((N, total_pad), x_dtype),
        grid=(grid_n,),
        in_specs=in_specs,
        out_specs=pl.BlockSpec((blk_n, total_pad), lambda i: (i, 0)),
        compiler_params=pltpu.CompilerParams(
            dimension_semantics=("parallel",),          # shard row tiles over TCs (v7x)
            vmem_limit_bytes=_VMEM_LIMIT_BYTES),
        cost_estimate=cost,
    )(*xs, w_all, b_all)


# ---------------------------------------------------------------------------
# VCNReadout (JAX / Pallas version)
# ---------------------------------------------------------------------------
Target = namedtuple("Target", ["name", "dim"])
Config = namedtuple("Config", ["mode", "hidden_dim", "graph_targets"])


class VCNReadoutPallas:
    def __init__(self, config, key, tile_n=4096):
        self.config = config
        self.classify = config.mode == "clf"
        self.hidden_dim = config.hidden_dim
        self.graph_targets = config.graph_targets
        if self.classify:
            assert len(self.graph_targets) == 1
        self.readout_dim = sum(t.dim for t in self.graph_targets)
        self.tile_n = tile_n

        # Per-target params, nn.Linear-style uniform(-1/sqrt(H), 1/sqrt(H)).
        # PyTorch weight is [dim, hidden]; stored pre-transposed [hidden, dim].
        bound = 1.0 / (self.hidden_dim ** 0.5)
        self.params = []
        for t in self.graph_targets:
            key, kw, kb = jax.random.split(key, 3)
            w = jax.random.uniform(kw, (self.hidden_dim, t.dim), jnp.float32,
                                   -bound, bound)
            b = jax.random.uniform(kb, (t.dim,), jnp.float32, -bound, bound)
            self.params.append((w, b))

        # Group targets by node name (each target reads the node named t.name).
        self.group_names = []
        group_targets = {}
        for i, t in enumerate(self.graph_targets):
            if t.name not in group_targets:
                group_targets[t.name] = []
                self.group_names.append(t.name)
            group_targets[t.name].append(i)
        self.num_groups = len(self.group_names)

        # Single minimally-padded output slab: every target gets a running
        # column offset inside one [*, P] slab, P = roundup(sum dims, 128).
        total_dim = sum(t.dim for t in self.graph_targets)
        self.total_pad = max(128, ((total_dim + 127) // 128) * 128)

        # Block-column weights [G, H, P] and packed bias [1, P], built once.
        H, P = self.hidden_dim, self.total_pad
        w_all = jnp.zeros((self.num_groups, H, P), jnp.float32)
        b_all = jnp.zeros((1, P), jnp.float32)
        self.target_group = [None] * len(self.graph_targets)
        self.target_col = [None] * len(self.graph_targets)
        col = 0
        for g, name in enumerate(self.group_names):
            for i in group_targets[name]:
                w, b = self.params[i]
                d = self.graph_targets[i].dim
                w_all = w_all.at[g, :, col:col + d].set(w)
                b_all = b_all.at[0, col:col + d].set(b)
                self.target_group[i] = g
                self.target_col[i] = col
                col += d
        self.w_all = w_all
        self.b_all = b_all
        # Per-dtype weight cache (avoids a per-call astype launch on bf16 path).
        self._w_cache = {jnp.dtype(jnp.float32): w_all}

    def _weights_for(self, dtype):
        dt = jnp.dtype(dtype)
        if dt not in self._w_cache:
            self._w_cache[dt] = self.w_all.astype(dt)
        return self._w_cache[dt]

    def __call__(self, G):
        # G: {node_name: hidden array [N, hidden_dim]}
        h = [G[name] for name in self.group_names]

        # Common case: all hidden tensors share N/dtype -> one fused pallas_call.
        # Ragged cases fall back to one fused call per (N, dtype) partition.
        parts = {}
        for g, x in enumerate(h):
            parts.setdefault((x.shape[0], jnp.dtype(x.dtype)), []).append(g)

        group_slab = [None] * self.num_groups
        for (_, dt), gids in parts.items():
            w_full = self._weights_for(dt)
            if len(gids) == self.num_groups:
                w = w_full
            else:
                w = w_full[jnp.asarray(gids)]
            xs = [h[g] for g in gids]
            slab = fused_readout_pallas(xs, w, self.b_all,
                                        self.total_pad, self.tile_n)
            for g in gids:
                group_slab[g] = slab

        out = {}
        for i, t in enumerate(self.graph_targets):
            slab = group_slab[self.target_group[i]]
            off = self.target_col[i]
            out[t.name] = slab[:, off:off + t.dim]
        return out


# ---------------------------------------------------------------------------
# Reference (plain JAX) for sanity check
# ---------------------------------------------------------------------------
def _ref_forward(module, G):
    out = {}
    for i, t in enumerate(module.graph_targets):
        w, b = module.params[i]
        out[t.name] = G[t.name].astype(jnp.float32) @ w + b
    return out


if __name__ == "__main__":
    key = jax.random.PRNGKey(0)

    hidden_dim = 32
    targets = [Target("energy", 8), Target("dipole", 4)]
    config = Config(mode="reg", hidden_dim=hidden_dim, graph_targets=targets)

    key, kmod = jax.random.split(key)
    readout = VCNReadoutPallas(config, kmod)

    # N=8: single full-dim row block.  N=40: two row tiles (one partial) to
    # exercise the >=2-tile megacore split and OOB-masked last block.
    for N in (8, 40):
        G = {}
        for t in targets:
            key, kh = jax.random.split(key)
            G[t.name] = jax.random.normal(kh, (N, hidden_dim), jnp.float32)

        # f32 path
        out = readout(G)
        out = jax.tree_util.tree_map(jax.block_until_ready, out)
        ref = _ref_forward(readout, G)
        for t in targets:
            assert out[t.name].shape == (N, t.dim)
            assert jnp.allclose(out[t.name], ref[t.name], atol=1e-5, rtol=1e-5)

        # bf16 hidden states (MXU bf16 path, f32 accumulation) -- looser tolerance.
        G_bf16 = {k: v.astype(jnp.bfloat16) for k, v in G.items()}
        out_bf16 = readout(G_bf16)
        out_bf16 = jax.tree_util.tree_map(jax.block_until_ready, out_bf16)
        for t in targets:
            assert out_bf16[t.name].dtype == jnp.bfloat16
            assert jnp.allclose(out_bf16[t.name].astype(jnp.float32),
                                ref[t.name], atol=5e-2, rtol=5e-2)

    print("KERNEL_OK")
</pallas_src>

<mosaic_0001>
module attributes {stable_mosaic.version = 11 : i64} {
  func.func @kernel(%arg0: i32, %arg1: memref<8x32xf32, #tpu.memory_space<vmem>>, %arg2: memref<8x32xf32, #tpu.memory_space<vmem>>, %arg3: memref<2x32x128xf32, #tpu.memory_space<vmem>>, %arg4: memref<1x128xf32, #tpu.memory_space<vmem>>, %arg5: memref<8x128xf32, #tpu.memory_space<vmem>>) attributes {dimension_semantics = [#tpu.dimension_semantics<parallel>], iteration_bounds = array<i64: 1>, scalar_prefetch = 0 : i64, scratch_operands = 0 : i64, tpu.core_type = #tpu.core_type<tc>, window_params = [{transform_indices = @transform_0, window_bounds = array<i64: 8, 32>}, {transform_indices = @transform_1, window_bounds = array<i64: 8, 32>}, {pipeline_mode = #tpu.pipeline_mode<synchronous>, transform_indices = @transform_2, window_bounds = array<i64: 2, 32, 128>}, {pipeline_mode = #tpu.pipeline_mode<synchronous>, transform_indices = @transform_3, window_bounds = array<i64: 1, 128>}, {transform_indices = @transform_4, window_bounds = array<i64: 8, 128>}]} {
    %c0 = arith.constant 0 : index
    %c0_0 = arith.constant 0 : index
    %0 = vector.load %arg1[%c0, %c0_0] : memref<8x32xf32, #tpu.memory_space<vmem>>, vector<8x32xf32>
    %c0_1 = arith.constant 0 : index
    %c0_2 = arith.constant 0 : index
    %c0_3 = arith.constant 0 : index
    %1 = vector.load %arg3[%c0_1, %c0_2, %c0_3] : memref<2x32x128xf32, #tpu.memory_space<vmem>>, vector<1x32x128xf32>
    %2 = vector.shape_cast %1 : vector<1x32x128xf32> to vector<32x128xf32>
    %cst = arith.constant dense<0.000000e+00> : vector<8x128xf32>
    %3 = tpu.matmul %0, %2, %cst {dimension_numbers = #tpu.dot_dimension_numbers<[1], [0], [0], [1], [0, 0, 1, 1], [], []>} : vector<8x32xf32>, vector<32x128xf32>, vector<8x128xf32> -> vector<8x128xf32>
    %c0_4 = arith.constant 0 : index
    %c0_5 = arith.constant 0 : index
    %4 = vector.load %arg2[%c0_4, %c0_5] : memref<8x32xf32, #tpu.memory_space<vmem>>, vector<8x32xf32>
    %c1 = arith.constant 1 : index
    %c0_6 = arith.constant 0 : index
    %c0_7 = arith.constant 0 : index
    %5 = vector.load %arg3[%c1, %c0_6, %c0_7] : memref<2x32x128xf32, #tpu.memory_space<vmem>>, vector<1x32x128xf32>
    %6 = vector.shape_cast %5 : vector<1x32x128xf32> to vector<32x128xf32>
    %cst_8 = arith.constant dense<0.000000e+00> : vector<8x128xf32>
    %7 = tpu.matmul %4, %6, %cst_8 {dimension_numbers = #tpu.dot_dimension_numbers<[1], [0], [0], [1], [0, 0, 1, 1], [], []>} : vector<8x32xf32>, vector<32x128xf32>, vector<8x128xf32> -> vector<8x128xf32>
    %8 = arith.addf %3, %7 : vector<8x128xf32>
    %c0_9 = arith.constant 0 : index
    %c0_10 = arith.constant 0 : index
    %9 = vector.load %arg4[%c0_9, %c0_10] : memref<1x128xf32, #tpu.memory_space<vmem>>, vector<1x128xf32>
    %10 = vector.broadcast %9 : vector<1x128xf32> to vector<8x128xf32>
    %11 = arith.addf %8, %10 : vector<8x128xf32>
    %c0_11 = arith.constant 0 : index
    %c0_12 = arith.constant 0 : index
    %12 = vector.load %arg5[%c0_11, %c0_12] : memref<8x128xf32, #tpu.memory_space<vmem>>, vector<8x128xf32>
    tpu.vector_store %arg5[%c0_11, %c0_12], %11 {strides = array<i32>} : memref<8x128xf32, #tpu.memory_space<vmem>>, vector<8x128xf32>,
    return
  }
  func.func @transform_0(%arg0: i32) -> (i32, i32) {
    %c0_i32 = arith.constant 0 : i32
    %c0_i32_0 = arith.constant 0 : i32
    return %arg0, %c0_i32 : i32, i32
  }
  func.func @transform_1(%arg0: i32) -> (i32, i32) {
    %c0_i32 = arith.constant 0 : i32
    %c0_i32_0 = arith.constant 0 : i32
    return %arg0, %c0_i32 : i32, i32
  }
  func.func @transform_2(%arg0: i32) -> (i32, i32, i32) {
    %c0_i32 = arith.constant 0 : i32
    %c0_i32_0 = arith.constant 0 : i32
    %c0_i32_1 = arith.constant 0 : i32
    %c0_i32_2 = arith.constant 0 : i32
    return %c0_i32, %c0_i32_0, %c0_i32_1 : i32, i32, i32
  }
  func.func @transform_3(%arg0: i32) -> (i32, i32) {
    %c0_i32 = arith.constant 0 : i32
    %c0_i32_0 = arith.constant 0 : i32
    %c0_i32_1 = arith.constant 0 : i32
    return %c0_i32, %c0_i32_0 : i32, i32
  }
  func.func @transform_4(%arg0: i32) -> (i32, i32) {
    %c0_i32 = arith.constant 0 : i32
    %c0_i32_0 = arith.constant 0 : i32
    return %arg0, %c0_i32 : i32, i32
  }
}

</mosaic_0001>

<bundles_post_ra>
// kernel: tpu_custom_call.1
= control target key start
LH: loop header
LB: loop body
LE: loop exit
PB: predicated region body
PF: predicated region fallthrough
CT: control target
= control target key end

     0   :  { %9 = vsyncpa [#allocation3], 0  ;;  %s473_s0 = inlined_call_operand.hbm [shape: f32[8,32], index: 0, kind: input, shape index: {}]   ;;  %s474_s1 = inlined_call_operand.hbm [shape: f32[8,32], index: 1, kind: input, shape index: {}]   ;;  %s475_s2 = inlined_call_operand.hbm [shape: f32[2,32,128], index: 2, kind: input, shape index: {}]   ;;  %s476_s3 = inlined_call_operand.vmem [shape: f32[1,128], index: 3, kind: input, shape index: {}]   ;;  %s477_s4 = inlined_call_operand.hbm [shape: f32[8,128], index: 4, kind: output, shape index: {}]  }
   0x1   :  { %10 = vsyncpa [#allocation6], 0 }
   0x2   :  { %11 = vsyncpa [#allocation4], 0  ;;  %s388_s15 = smov [#allocation5]   ;;  %s389_s17 = smov [#allocation2]  }
   0x3   :  { %s28_s16 = sshll.u32 %s388_s15, 4  ;;  %s18_s18 = sshll.u32 %s389_s17, 4  ;;  %s29_s16 = int_to_ptr.vmem [resolvable:$true] %s28_s16  ;;  %s19_s18 = int_to_ptr.vmem [resolvable:$true] %s18_s18 }
   0x4   :  { %s294_s21 = scalar_lea.hbm %s474_s1, 128 }
   0x5   :  { %p295_p0 = scmp.ne.s32.totalorder %s474_s1, %s294_s21  ;;  %p298_p1 = scmp.lt.u32.totalorder %s294_s21, %s474_s1 }
   0x7   :  { %p300_p2 = pnand %p298_p1, %p295_p0 }
   0x9   :  { %303 = shalt.err (!%p300_p2)
}
   0xa   :  { %s304_s26 = scalar_lea.vmem %s29_s16, 128  ;;  %p309_p4 = scmp.lt.s32.totalorder %s29_s16, %s29_s16 }
   0xb   :  { %p305_p3 = scmp.ne.s32.totalorder %s29_s16, %s304_s26  ;;  %p310_p5 = scmp.lt.s32.totalorder %s304_s26, %s304_s26 }
   0xd   :  { %p311_p6 = por %p310_p5, %p309_p4 }
   0xf   :  { %p312_p7 = pnand %p311_p6, %p305_p3 }
  0x11   :  { %315 = shalt.err (!%p312_p7)
}
  0x12   :  { %31 = dma.hbm_to_vmem [thread:$0]  %s474_s1, 128, %s29_s16, [#allocation6]  }
  0x13   :  { %s316_s5 = scalar_lea.hbm %s473_s0, 128 }
  0x14   :  { %p317_p8 = scmp.ne.s32.totalorder %s473_s0, %s316_s5  ;;  %p320_p9 = scmp.lt.u32.totalorder %s316_s5, %s473_s0 }
  0x16   :  { %p322_p10 = pnand %p320_p9, %p317_p8 }
  0x18   :  { %325 = shalt.err (!%p322_p10)
}
  0x19   :  { %s326_s10 = scalar_lea.vmem %s19_s18, 128  ;;  %p331_p12 = scmp.lt.s32.totalorder %s19_s18, %s19_s18 }
  0x1a   :  { %p327_p11 = scmp.ne.s32.totalorder %s19_s18, %s326_s10  ;;  %p332_p13 = scmp.lt.s32.totalorder %s326_s10, %s326_s10 }
  0x1c   :  { %p333_p0 = por %p332_p13, %p331_p12 }
  0x1e   :  { %p334_p1 = pnand %p333_p0, %p327_p11 }
  0x20   :  { %337 = shalt.err (!%p334_p1)
}
  0x21   :  { %21 = dma.hbm_to_vmem [thread:$0]  %s473_s0, 128, %s19_s18, [#allocation3]  }
  0x22   :  { %s390_s12 = smov [#allocation7]   ;;  %s338_s16 = scalar_lea.hbm %s475_s2, 1024 }
  0x23   :  { %s37_s13 = sshll.u32 %s390_s12, 4  ;;  %p339_p2 = scmp.ne.s32.totalorder %s475_s2, %s338_s16  ;;  %s38_s13 = int_to_ptr.vmem [resolvable:$true] %s37_s13 }
  0x24   :  { %p342_p3 = scmp.lt.u32.totalorder %s338_s16, %s475_s2 }
  0x26   :  { %p344_p4 = pnand %p342_p3, %p339_p2 }
  0x28   :  { %347 = shalt.err (!%p344_p4)
}
  0x29   :  { %s348_s22 = scalar_lea.vmem %s38_s13, 1024  ;;  %p353_p6 = scmp.lt.s32.totalorder %s38_s13, %s38_s13 }
  0x2a   :  { %p349_p5 = scmp.ne.s32.totalorder %s38_s13, %s348_s22  ;;  %p354_p7 = scmp.lt.s32.totalorder %s348_s22, %s348_s22 }
  0x2c   :  { %p355_p8 = por %p354_p7, %p353_p6 }
  0x2e   :  { %p356_p9 = pnand %p355_p8, %p349_p5 }
  0x30   :  { %359 = shalt.err (!%p356_p9)
}
  0x31   :  { %s391_s0 = smov 128   ;;  %s392_s18 = smov 8  }
  0x32   :  { %43 = dma.hbm_to_vmem [thread:$0]  %s475_s2, 1024, %s38_s13, [#allocation6], %s391_s0, %s391_s0, %s392_s18  }
  0x33   :  { %382 = dma.done.wait [#allocation3], 128  }
  0x34   :  { %383 = vsyncadd [#allocation3], 4294967168 }
  0x35   :  { %384 = dma.done.wait [#allocation6], 1152  }
  0x36   :  { %385 = vsyncadd [#allocation6], 4294966144  ;;  %v393_v0 = vmov 0.0|0.0   ;;  %vm394_vm0 = vmmov 0   ;;  %v395_v1 = vmov 0.0   ;;  %v62_v2 = vld [vmem:[#allocation7 + $0x20] sm:$0xff] }
  0x37   :  { %273 = vmatprep.subr.bf16.mxu0 %v393_v0  ;;  %279 = vmatprep.subr.bf16.mxu1 %v393_v0  ;;  %v63_v3 = vld [vmem:[#allocation7 + $0x28] sm:$0xff]  ;;  %v56_v4 = vld [vmem:[#allocation7] sm:$0xff]  ;;  %v64_v7 = vld [vmem:[#allocation7 + $0x30] sm:$0xff]  ;;  %vm66_vm1 = vcmask 261120   ;;  %s396_s26 = smov [#allocation8]  }
  0x38   :  { %259 = vmatprep.mubr.msk.f32.mxu0 %vm394_vm0, %v395_v1  ;;  %270 = vmatprep.mubr.msk.f32.mxu1 %vm394_vm0, %v395_v1  ;;  %v274_v5 = vpack.c.bf16 %v63_v3, %v62_v2  ;;  %v57_v6 = vld [vmem:[#allocation7 + $0x8] sm:$0xff]  ;;  %v65_v8 = vld [vmem:[#allocation7 + $0x38] sm:$0xff]  ;;  %v58_v10 = vld [vmem:[#allocation7 + $0x10] sm:$0xff]  ;;  %s228_s27 = sshll.u32 %s396_s26, 4  ;;  %s229_s27 = int_to_ptr.vmem [resolvable:$true] %s228_s27 }
  0x39   :  { %v280_v9 = vpack.c.bf16 %v57_v6, %v56_v4  ;;  %v59_v11 = vld [vmem:[#allocation7 + $0x18] sm:$0xff]  ;;  %v277_v12 = vpack.c.bf16 %v65_v8, %v64_v7  ;;  %v55_v15 = vld [vmem:[#allocation2] sm:$0xff]  ;;  %s360_s28 = scalar_lea.vmem %s229_s27, 128  ;;  %p365_p11 = scmp.lt.s32.totalorder %s229_s27, %s229_s27 }
  0x3a   :  { %275 = vmatpush3.bf16.msra.mxu0 %v274_v5  ;;  %v283_v13 = vpack.c.bf16 %v59_v11, %v58_v10  ;;  %v60_v14 = vld [vmem:[#allocation5] sm:$0xff]  ;;  %v240_v18 = vld [vmem:[%s476_s3] ss:$0 sm:$0xff]  ;;  %p361_p10 = scmp.ne.s32.totalorder %s229_s27, %s360_s28  ;;  %p366_p12 = scmp.lt.s32.totalorder %s360_s28, %s360_s28 }
  0x3b   :  { %281 = vmatpush3.bf16.msra.mxu1 %v280_v9  ;;  %276 = vmatprep.subr.bf16.mxu0 %v393_v0 }
  0x3c   :  { %282 = vmatprep.subr.bf16.mxu1 %v393_v0  ;;  %p367_p13 = por %p366_p12, %p365_p11 }
  0x3e   :  { %278 = vmatpush3.bf16.msra.mxu0 %v277_v12  ;;  %p368_p0 = pnand %p367_p13, %p361_p10 }
  0x3f   :  { %284 = vmatpush3.bf16.msra.mxu1 %v283_v13 }
  0x41   :  { %260 = vmatmul.mubr.msk.f32.vlgmr.msra.gmra.mrb[0].mxu0 %vm66_vm1, %v60_v14 }
  0x42   :  { %271 = vmatmul.mubr.msk.f32.vlgmr.msra.gmra.mrb[0].mxu1 %vm66_vm1, %v55_v15 }
 0x114   :  { %v136_v16 = vpop.f32.mrb[0].mxu0 }
 0x115   :  { %v209_v17 = vpop.f32.mrb[0].mxu1  ;;  %v261_v19 = vpop.f32.mrb[1].mxu0 }
 0x116   :  { %v210_v20 = vadd.f32 %v209_v17, %v136_v16  ;;  %v272_v21 = vpop.f32.mrb[1].mxu1 }
 0x118   :  { %v220_v22 = vadd.f32 %v240_v18, %v210_v20 }
 0x11a   :  { %221 = vst [vmem:[#allocation8] sm:$0xff] %v220_v22 }
 0x11b   :  { %371 = shalt.err (!%p368_p0)
}
 0x11c   :  { %s372_s5 = scalar_lea.hbm %s477_s4, 128 }
 0x11d   :  { %p373_p1 = scmp.ne.s32.totalorder %s477_s4, %s372_s5  ;;  %p376_p2 = scmp.lt.u32.totalorder %s372_s5, %s477_s4 }
 0x11f   :  { %p378_p3 = pnand %p376_p2, %p373_p1 }
 0x121   :  { %381 = shalt.err (!%p378_p3)
}
 0x122   :  { %231 = dma.vmem_to_hbm [thread:$0]  %s229_s27, 128, %s477_s4, [#allocation4]  }
 0x123   :  { %386 = dma.done.wait [#allocation4], 128  }
 0x124   :  { %387 = vsyncadd [#allocation4], 4294967168 }
 0x125   :  { %235 = vsyncpa [#allocation3], 1 }
 0x126   :  { %236 = vsyncpa [#allocation6], 1 }
 0x127   :  { %237 = vsyncpa [#allocation4], 1 }

</bundles_post_ra>
